<compile_context>
chip_gen: v7x
topology: tpu7x:2x2x1
jax: 0.10.0
libtpu: 0.0.40
codegen_flags: <defaults>
</compile_context>

<pallas_src>
import functools

import jax
import jax.numpy as jnp
import numpy as np
from jax.experimental import pallas as pl
from jax.experimental.pallas import tpu as pltpu

EPS = 1e-5
LANE = 128
SUBLANE = 8
N_PCOLS = 8  # columns in the packed parameter slab (7 used + 1 pad)

# packed-slab column indices
_C_WC1, _C_WC2, _C_WOC, _C_SH1, _C_SH2, _C_WOD, _C_BO = range(7)


def _round_up(n, m):
    return ((n + m - 1) // m) * m


def _pad1(v, n):
    return jnp.pad(v, (0, n - v.shape[0]))


# --------------------------------------------------------------------------
# Kernel: one batch tile [Dp, block_b] -> sigmoid logits (1, block_b)
# --------------------------------------------------------------------------
def dcn_kernel(x_ref, w1_ref, w2_ref, p_ref, out_ref, *, dp, h1p, h2p):
    xT = x_ref[...]                                   # [Dp, TB] f32 (batch on lanes)

    # resident packed params (feature axis on sublanes -> natural lane broadcast)
    wc1 = p_ref[0:dp, _C_WC1:_C_WC1 + 1]              # [Dp, 1]
    wc2 = p_ref[0:dp, _C_WC2:_C_WC2 + 1]
    wo_c = p_ref[0:dp, _C_WOC:_C_WOC + 1]
    sh1 = p_ref[0:h1p, _C_SH1:_C_SH1 + 1]             # [H1p, 1]
    sh2 = p_ref[0:h2p, _C_SH2:_C_SH2 + 1]             # [H2p, 1]
    wo_d = p_ref[0:h2p, _C_WOD:_C_WOD + 1]
    bo = p_ref[0:1, _C_BO:_C_BO + 1]                  # [1, 1]

    # ---- cross network, algebraically collapsed (cross bias == 0, f32 VPU) ----
    s1 = jnp.sum(xT * wc1, axis=0, keepdims=True)     # [1, TB]
    s2 = jnp.sum(xT * wc2, axis=0, keepdims=True)     # [1, TB]
    s3 = jnp.sum(xT * wo_c, axis=0, keepdims=True)    # [1, TB]
    cross_term = (1.0 + s1) * (1.0 + s2) * s3         # = sum(cross_out * wo_c)

    # ---- DNN tower: (Linear, BN scale pre-folded into W) -> +shift -> ReLU ----
    xb = xT.astype(jnp.bfloat16)
    z1 = jnp.dot(w1_ref[...], xb, preferred_element_type=jnp.float32)   # [H1p, TB]
    h1 = jnp.maximum(z1 + sh1, 0.0)
    z2 = jnp.dot(w2_ref[...], h1.astype(jnp.bfloat16),
                 preferred_element_type=jnp.float32)                    # [H2p, TB]
    h2 = jnp.maximum(z2 + sh2, 0.0)

    # ---- output head: VPU mul + sublane reduce (no N=1 matmul) ----------------
    logit = cross_term + jnp.sum(h2 * wo_d, axis=0, keepdims=True) + bo  # [1, TB]
    out_ref[...] = jax.nn.sigmoid(logit)              # lane-dense, unmasked store


# --------------------------------------------------------------------------
# Parameter packing (wrapper-side constant folding)
# --------------------------------------------------------------------------
def pack_dcn_params(params, D, H1, H2):
    Dp = _round_up(D, SUBLANE)
    H1p = _round_up(H1, SUBLANE)
    H2p = _round_up(H2, SUBLANE)
    Fp = max(Dp, H1p, H2p)
    assert params["wo"].shape[0] == D + H2, "output weight must cover cross+dnn"

    # fold Linear bias + inference-mode BatchNorm into scale/shift, then fold
    # the scale into the weight rows (pre-bf16-cast) so only the shift remains.
    sc1 = params["g1"] / jnp.sqrt(params["rv1"] + EPS)
    sh1 = (params["b1"] - params["rm1"]) * sc1 + params["be1"]
    sc2 = params["g2"] / jnp.sqrt(params["rv2"] + EPS)
    sh2 = (params["b2"] - params["rm2"]) * sc2 + params["be2"]

    wo_cross = params["wo"][:D]
    wo_dnn = params["wo"][D:]

    # zero padding of wc/wo/sh beyond the true dims is required for correctness
    # (padded activation rows / tower rows must contribute exactly 0).
    cols = [
        _pad1(params["wc1"], Fp), _pad1(params["wc2"], Fp), _pad1(wo_cross, Fp),
        _pad1(sh1, Fp), _pad1(sh2, Fp), _pad1(wo_dnn, Fp),
    ]
    slab = jnp.stack(cols, axis=1)                                    # [Fp, 6]
    slab = jnp.pad(slab, ((0, 0), (0, N_PCOLS - slab.shape[1])))      # [Fp, 8]
    slab = slab.at[0, _C_BO].set(params["bo"])

    w1f = sc1[:, None] * params["w1"]          # BN scale folded (f32), then cast
    w2f = sc2[:, None] * params["w2"]
    w1b = jnp.zeros((H1p, Dp), jnp.float32).at[:H1, :D].set(w1f).astype(jnp.bfloat16)
    w2b = jnp.zeros((H2p, H1p), jnp.float32).at[:H2, :H1].set(w2f).astype(jnp.bfloat16)
    return w1b, w2b, slab, (Dp, H1p, H2p)


# --------------------------------------------------------------------------
# Glue: embedding gather + concat emitted directly in feature-major layout
# --------------------------------------------------------------------------
def build_xT(emb_tables, X_sparse, X_dense, Dp, B_pad):
    """Builds the zero-padded, feature-major activation [Dp, B_pad] without ever
    materializing a [B, D] array + separate transpose in HBM."""
    B = X_sparse.shape[0]
    cols = [jnp.take(t.T, X_sparse[:, i], axis=1)                     # [E, B]
            for i, t in enumerate(emb_tables)]
    cols.append(X_dense.T)                                            # [num_dense, B]
    D = sum(c.shape[0] for c in cols)
    if Dp > D:
        cols.append(jnp.zeros((Dp - D, B), jnp.float32))
    xT = jnp.concatenate(cols, axis=0)                                # [Dp, B]
    if B_pad > B:
        xT = jnp.pad(xT, ((0, 0), (0, B_pad - B)))
    return xT


def pick_block_b(B):
    # Large tiles amortize the ~0.35 us per-grid-step overhead; keep G >= 2 so
    # the 'parallel' batch axis shards across both v7x TensorCores; cap at 2048
    # (activation double-buffer + temporaries stay << v5e's 16 MiB scoped VMEM).
    bb = _round_up(max(1, pl.cdiv(B, 2)), LANE)
    return int(max(LANE, min(2048, bb)))


# --------------------------------------------------------------------------
# Wrapper
# --------------------------------------------------------------------------
def dcn_forward(emb_tables, X_sparse, X_dense, params, *, block_b=None):
    B = X_sparse.shape[0]
    H1 = params["w1"].shape[0]
    H2 = params["w2"].shape[0]
    D = sum(int(t.shape[1]) for t in emb_tables) + X_dense.shape[1]

    w1b, w2b, slab, (Dp, H1p, H2p) = pack_dcn_params(params, D, H1, H2)
    Fp = slab.shape[0]

    bb = pick_block_b(B) if block_b is None else block_b
    G = pl.cdiv(B, bb)
    B_pad = G * bb

    xT = build_xT(emb_tables, X_sparse, X_dense, Dp, B_pad)           # [Dp, B_pad]

    kernel = functools.partial(dcn_kernel, dp=Dp, h1p=H1p, h2p=H2p)
    out = pl.pallas_call(
        kernel,
        out_shape=jax.ShapeDtypeStruct((1, B_pad), jnp.float32),
        grid_spec=pltpu.PrefetchScalarGridSpec(
            num_scalar_prefetch=0,
            grid=(G,),
            in_specs=[
                # activation tile: (Dp, block_b) is (8,128)-aligned
                pl.BlockSpec((Dp, bb), lambda i: (0, i)),
                # resident full-array blocks (exempt from the (8,128) rule);
                # double-buffering of these tiny constants costs ~a few KiB,
                # not worth pl.Buffered(1) at this footprint.
                pl.BlockSpec((H1p, Dp), lambda i: (0, 0)),
                pl.BlockSpec((H2p, H1p), lambda i: (0, 0)),
                pl.BlockSpec((Fp, N_PCOLS), lambda i: (0, 0)),
            ],
            out_specs=pl.BlockSpec((1, bb), lambda i: (0, i)),         # lane-dense
        ),
        compiler_params=pltpu.CompilerParams(
            dimension_semantics=("parallel",)),                        # megacore
    )(xT, w1b, w2b, slab)
    # padded batch columns [B:B_pad] hold garbage and are sliced off here.
    return out[0, :B].reshape(B, 1)


# --------------------------------------------------------------------------
# Parameter construction (deterministic stand-ins for the torch module)
# --------------------------------------------------------------------------
def make_params(key, D, hidden_dims):
    H1, H2 = hidden_dims
    ks = jax.random.split(key, 15)
    s = 0.1
    return {
        # cross-layer weight vectors (fixed stand-ins for per-call torch.randn)
        "wc1": jax.random.normal(ks[0], (D,), jnp.float32),
        "wc2": jax.random.normal(ks[1], (D,), jnp.float32),
        # linear_1 / batchNorm_1 (torch Linear layout [out, in])
        "w1": s * jax.random.normal(ks[2], (H1, D), jnp.float32),
        "b1": s * jax.random.normal(ks[3], (H1,), jnp.float32),
        "g1": 1.0 + 0.1 * jax.random.normal(ks[4], (H1,), jnp.float32),
        "be1": 0.1 * jax.random.normal(ks[5], (H1,), jnp.float32),
        "rm1": 0.1 * jax.random.normal(ks[6], (H1,), jnp.float32),
        "rv1": 0.5 + jax.random.uniform(ks[7], (H1,), jnp.float32),
        # linear_2 / batchNorm_2
        "w2": s * jax.random.normal(ks[8], (H2, H1), jnp.float32),
        "b2": s * jax.random.normal(ks[9], (H2,), jnp.float32),
        "g2": 1.0 + 0.1 * jax.random.normal(ks[10], (H2,), jnp.float32),
        "be2": 0.1 * jax.random.normal(ks[11], (H2,), jnp.float32),
        "rm2": 0.1 * jax.random.normal(ks[12], (H2,), jnp.float32),
        "rv2": 0.5 + jax.random.uniform(ks[13], (H2,), jnp.float32),
        # output Linear(D + H2, 1)
        "wo": s * jax.random.normal(ks[14], (D + H2,), jnp.float32),
        "bo": jnp.zeros((), jnp.float32),
    }


# --------------------------------------------------------------------------
# Pure-JAX reference (same fixed cross weights / inference BN / no dropout)
# --------------------------------------------------------------------------
def dcn_reference(embed_input, params):
    x0 = embed_input
    x1 = x0
    for wc in (params["wc1"], params["wc2"]):
        res = jnp.sum(x1 * wc[None, :], axis=-1, keepdims=True)
        x1 = x0 * res + x1
    cross_out = x1
    h = x0
    for (w, b, g, be, rm, rv) in (
        (params["w1"], params["b1"], params["g1"], params["be1"],
         params["rm1"], params["rv1"]),
        (params["w2"], params["b2"], params["g2"], params["be2"],
         params["rm2"], params["rv2"]),
    ):
        z = h @ w.T + b
        z = (z - rm) / jnp.sqrt(rv + EPS) * g + be
        h = jnp.maximum(z, 0.0)
    stack = jnp.concatenate([cross_out, h], axis=-1)
    logit = stack @ params["wo"][:, None] + params["bo"]
    return jax.nn.sigmoid(logit)


if __name__ == "__main__":
    key = jax.random.PRNGKey(0)

    # Small, module-consistent config
    cate_fea_uniques = [10, 20, 30, 40]    # 4 categorical features
    emb_size = 8
    num_fea_size = 4
    hidden_dims = [32, 16]
    batch = 256                            # auto block_b=128 -> G=2 (real grid)

    n_cate = len(cate_fea_uniques)
    D = n_cate * emb_size + num_fea_size   # 36 -> Dp = 40

    k_emb, k_par, k_sp, k_dn = jax.random.split(key, 4)

    emb_keys = jax.random.split(k_emb, n_cate)
    emb_tables = [jax.random.normal(emb_keys[i],
                                    (cate_fea_uniques[i], emb_size), jnp.float32)
                  for i in range(n_cate)]

    params = make_params(k_par, D, hidden_dims)

    sp_keys = jax.random.split(k_sp, n_cate)
    X_sparse = jnp.stack(
        [jax.random.randint(sp_keys[i], (batch,), 0, cate_fea_uniques[i])
         for i in range(n_cate)], axis=1)                        # [B, n_cate] int32
    X_dense = jax.random.normal(k_dn, (batch, num_fea_size), jnp.float32)

    out = dcn_forward(emb_tables, X_sparse, X_dense, params)
    jax.block_until_ready(out)
    assert out.shape == (batch, 1)

    # reference path (batch-major layout, plain JAX)
    sparse_embeds = [emb_tables[i][X_sparse[:, i]] for i in range(n_cate)]
    embed_input = jnp.concatenate(sparse_embeds + [X_dense], axis=-1)  # [B, D]
    ref = dcn_reference(embed_input, params)
    np.testing.assert_allclose(np.asarray(out), np.asarray(ref), atol=5e-2, rtol=0)

    print("KERNEL_OK")
</pallas_src>

<mosaic_0001>
module attributes {stable_mosaic.version = 11 : i64} {
  func.func @dcn_kernel(%arg0: i32, %arg1: memref<40x128xf32, #tpu.memory_space<vmem>>, %arg2: memref<32x40xbf16, #tpu.memory_space<vmem>>, %arg3: memref<16x32xbf16, #tpu.memory_space<vmem>>, %arg4: memref<40x8xf32, #tpu.memory_space<vmem>>, %arg5: memref<1x128xf32, #tpu.memory_space<vmem>>) attributes {dimension_semantics = [#tpu.dimension_semantics<parallel>], iteration_bounds = array<i64: 2>, scalar_prefetch = 0 : i64, scratch_operands = 0 : i64, tpu.core_type = #tpu.core_type<tc>, window_params = [{transform_indices = @transform_0, window_bounds = array<i64: 40, 128>}, {pipeline_mode = #tpu.pipeline_mode<synchronous>, transform_indices = @transform_1, window_bounds = array<i64: 32, 40>}, {pipeline_mode = #tpu.pipeline_mode<synchronous>, transform_indices = @transform_2, window_bounds = array<i64: 16, 32>}, {pipeline_mode = #tpu.pipeline_mode<synchronous>, transform_indices = @transform_3, window_bounds = array<i64: 40, 8>}, {transform_indices = @transform_4, window_bounds = array<i64: 1, 128>}]} {
    %c0 = arith.constant 0 : index
    %c0_0 = arith.constant 0 : index
    %0 = vector.load %arg1[%c0, %c0_0] : memref<40x128xf32, #tpu.memory_space<vmem>>, vector<40x128xf32>
    %c0_1 = arith.constant 0 : index
    %c0_2 = arith.constant 0 : index
    %1 = vector.load %arg4[%c0_1, %c0_2] : memref<40x8xf32, #tpu.memory_space<vmem>>, vector<40x1xf32>
    %c0_3 = arith.constant 0 : index
    %c1 = arith.constant 1 : index
    %2 = vector.load %arg4[%c0_3, %c1] : memref<40x8xf32, #tpu.memory_space<vmem>>, vector<40x1xf32>
    %c0_4 = arith.constant 0 : index
    %c2 = arith.constant 2 : index
    %3 = vector.load %arg4[%c0_4, %c2] : memref<40x8xf32, #tpu.memory_space<vmem>>, vector<40x1xf32>
    %c0_5 = arith.constant 0 : index
    %c3 = arith.constant 3 : index
    %4 = vector.load %arg4[%c0_5, %c3] : memref<40x8xf32, #tpu.memory_space<vmem>>, vector<32x1xf32>
    %c0_6 = arith.constant 0 : index
    %c4 = arith.constant 4 : index
    %5 = vector.load %arg4[%c0_6, %c4] : memref<40x8xf32, #tpu.memory_space<vmem>>, vector<16x1xf32>
    %c0_7 = arith.constant 0 : index
    %c5 = arith.constant 5 : index
    %6 = vector.load %arg4[%c0_7, %c5] : memref<40x8xf32, #tpu.memory_space<vmem>>, vector<16x1xf32>
    %c0_8 = arith.constant 0 : index
    %c6 = arith.constant 6 : index
    %7 = vector.load %arg4[%c0_8, %c6] : memref<40x8xf32, #tpu.memory_space<vmem>>, vector<1x1xf32>
    %8 = vector.broadcast %1 : vector<40x1xf32> to vector<40x128xf32>
    %9 = arith.mulf %0, %8 : vector<40x128xf32>
    %cst = arith.constant dense<0.000000e+00> : vector<128xf32>
    %10 = vector.multi_reduction <add>, %9, %cst [0] : vector<40x128xf32> to vector<128xf32>
    %11 = vector.shape_cast %10 : vector<128xf32> to vector<1x128xf32>
    %12 = vector.broadcast %2 : vector<40x1xf32> to vector<40x128xf32>
    %13 = arith.mulf %0, %12 : vector<40x128xf32>
    %cst_9 = arith.constant dense<0.000000e+00> : vector<128xf32>
    %14 = vector.multi_reduction <add>, %13, %cst_9 [0] : vector<40x128xf32> to vector<128xf32>
    %15 = vector.shape_cast %14 : vector<128xf32> to vector<1x128xf32>
    %16 = vector.broadcast %3 : vector<40x1xf32> to vector<40x128xf32>
    %17 = arith.mulf %0, %16 : vector<40x128xf32>
    %cst_10 = arith.constant dense<0.000000e+00> : vector<128xf32>
    %18 = vector.multi_reduction <add>, %17, %cst_10 [0] : vector<40x128xf32> to vector<128xf32>
    %19 = vector.shape_cast %18 : vector<128xf32> to vector<1x128xf32>
    %cst_11 = arith.constant 1.000000e+00 : f32
    %20 = vector.broadcast %cst_11 : f32 to vector<1x128xf32>
    %21 = arith.addf %20, %11 : vector<1x128xf32>
    %cst_12 = arith.constant 1.000000e+00 : f32
    %22 = vector.broadcast %cst_12 : f32 to vector<1x128xf32>
    %23 = arith.addf %22, %15 : vector<1x128xf32>
    %24 = arith.mulf %21, %23 : vector<1x128xf32>
    %25 = arith.mulf %24, %19 : vector<1x128xf32>
    %26 = arith.truncf %0 : vector<40x128xf32> to vector<40x128xbf16>
    %c0_13 = arith.constant 0 : index
    %c0_14 = arith.constant 0 : index
    %27 = vector.load %arg2[%c0_13, %c0_14] : memref<32x40xbf16, #tpu.memory_space<vmem>>, vector<32x40xbf16>
    %cst_15 = arith.constant dense<0.000000e+00> : vector<32x128xf32>
    %28 = tpu.matmul %27, %26, %cst_15 {dimension_numbers = #tpu.dot_dimension_numbers<[1], [0], [0], [1], [0, 0, 1, 1], [], []>} : vector<32x40xbf16>, vector<40x128xbf16>, vector<32x128xf32> -> vector<32x128xf32>
    %29 = vector.broadcast %4 : vector<32x1xf32> to vector<32x128xf32>
    %30 = arith.addf %28, %29 : vector<32x128xf32>
    %cst_16 = arith.constant 0.000000e+00 : f32
    %31 = vector.broadcast %cst_16 : f32 to vector<32x128xf32>
    %32 = arith.maximumf %30, %31 : vector<32x128xf32>
    %c0_17 = arith.constant 0 : index
    %c0_18 = arith.constant 0 : index
    %33 = vector.load %arg3[%c0_17, %c0_18] : memref<16x32xbf16, #tpu.memory_space<vmem>>, vector<16x32xbf16>
    %34 = arith.truncf %32 : vector<32x128xf32> to vector<32x128xbf16>
    %cst_19 = arith.constant dense<0.000000e+00> : vector<16x128xf32>
    %35 = tpu.matmul %33, %34, %cst_19 {dimension_numbers = #tpu.dot_dimension_numbers<[1], [0], [0], [1], [0, 0, 1, 1], [], []>} : vector<16x32xbf16>, vector<32x128xbf16>, vector<16x128xf32> -> vector<16x128xf32>
    %36 = vector.broadcast %5 : vector<16x1xf32> to vector<16x128xf32>
    %37 = arith.addf %35, %36 : vector<16x128xf32>
    %cst_20 = arith.constant 0.000000e+00 : f32
    %38 = vector.broadcast %cst_20 : f32 to vector<16x128xf32>
    %39 = arith.maximumf %37, %38 : vector<16x128xf32>
    %40 = vector.broadcast %6 : vector<16x1xf32> to vector<16x128xf32>
    %41 = arith.mulf %39, %40 : vector<16x128xf32>
    %cst_21 = arith.constant dense<0.000000e+00> : vector<128xf32>
    %42 = vector.multi_reduction <add>, %41, %cst_21 [0] : vector<16x128xf32> to vector<128xf32>
    %43 = vector.shape_cast %42 : vector<128xf32> to vector<1x128xf32>
    %44 = arith.addf %25, %43 : vector<1x128xf32>
    %45 = vector.broadcast %7 : vector<1x1xf32> to vector<1x128xf32>
    %46 = arith.addf %44, %45 : vector<1x128xf32>
    %47 = arith.negf %46 : vector<1x128xf32>
    %48 = math.exp %47 : vector<1x128xf32>
    %cst_22 = arith.constant 1.000000e+00 : f32
    %49 = vector.broadcast %cst_22 : f32 to vector<1x128xf32>
    %50 = arith.addf %49, %48 : vector<1x128xf32>
    %51 = arith.divf %49, %50 : vector<1x128xf32>
    %c0_23 = arith.constant 0 : index
    %c0_24 = arith.constant 0 : index
    %52 = vector.load %arg5[%c0_23, %c0_24] : memref<1x128xf32, #tpu.memory_space<vmem>>, vector<1x128xf32>
    tpu.vector_store %arg5[%c0_23, %c0_24], %51 {strides = array<i32>} : memref<1x128xf32, #tpu.memory_space<vmem>>, vector<1x128xf32>,
    return
  }
  func.func @transform_0(%arg0: i32) -> (i32, i32) {
    %c0_i32 = arith.constant 0 : i32
    %c0_i32_0 = arith.constant 0 : i32
    return %c0_i32, %arg0 : i32, i32
  }
  func.func @transform_1(%arg0: i32) -> (i32, i32) {
    %c0_i32 = arith.constant 0 : i32
    %c0_i32_0 = arith.constant 0 : i32
    %c0_i32_1 = arith.constant 0 : i32
    return %c0_i32, %c0_i32_0 : i32, i32
  }
  func.func @transform_2(%arg0: i32) -> (i32, i32) {
    %c0_i32 = arith.constant 0 : i32
    %c0_i32_0 = arith.constant 0 : i32
    %c0_i32_1 = arith.constant 0 : i32
    return %c0_i32, %c0_i32_0 : i32, i32
  }
  func.func @transform_3(%arg0: i32) -> (i32, i32) {
    %c0_i32 = arith.constant 0 : i32
    %c0_i32_0 = arith.constant 0 : i32
    %c0_i32_1 = arith.constant 0 : i32
    return %c0_i32, %c0_i32_0 : i32, i32
  }
  func.func @transform_4(%arg0: i32) -> (i32, i32) {
    %c0_i32 = arith.constant 0 : i32
    %c0_i32_0 = arith.constant 0 : i32
    return %c0_i32, %arg0 : i32, i32
  }
}

</mosaic_0001>

<bundles_post_ra>
// kernel: tpu_custom_call.1
= control target key start
LH: loop header
LB: loop body
LE: loop exit
PB: predicated region body
PF: predicated region fallthrough
CT: control target
= control target key end

     0   :  { %9 = vsyncpa [#allocation3], 0  ;;  %s1097_s0 = inlined_call_operand.hbm [shape: f32[40,256], index: 0, kind: input, shape index: {}]   ;;  %s1098_s1 = inlined_call_operand.vmem [shape: bf16[32,40], index: 1, kind: input, shape index: {}]   ;;  %s1099_s2 = inlined_call_operand.vmem [shape: bf16[16,32], index: 2, kind: input, shape index: {}]   ;;  %s1100_s3 = inlined_call_operand.vmem [shape: f32[40,8], index: 3, kind: input, shape index: {}]   ;;  %s1101_s4 = inlined_call_operand.hbm [shape: f32[1,256], index: 4, kind: output, shape index: {}]  }
   0x1   :  { %11 = vsyncpa [#allocation3 + $0x1], 0 }
   0x2   :  { %12 = vsyncpa [#allocation4], 0 }
   0x3   :  { %14 = vsyncpa [#allocation4 + $0x1], 0  ;;  %s877_s15 = smov 0   ;;  %s879_s16 = smov 0  }
   0x4   :  { %s881_s17 = smov 0   ;;  %s883_s18 = smov 0  }
   0x5 LB: > { %s898_s19 = sadd.s32 4294967295, %s836_s18   ;;  %s611_s20 = sadd.s32 4294967294, %s836_s18   ;;  %s836_s18 = sphi %s883_s18, %s1114_s18   ;;  %s832_s17 = sphi %s881_s17, %s1113_s17   ;;  %s828_s16 = sphi %s879_s16, %s1112_s16   ;;  %s824_s15 = sphi %s877_s15, %s1111_s15  }
   0x6   : > { %s902_s21 = sadd.s32 1, %s836_s18   ;;  %s27_s22 = sadd.s32 1, %s832_s17 }
   0x7   : > { %s24_s23 = ssub.s32 %s836_s18, %s902_s21  ;;  %p34_p0 = scmp.ne.s32.totalorder %s832_s17, %s828_s16 }
   0x8   : > { %p25_p1 = scmp.eq.s32.totalorder %s24_s23, 0  ;;  %p35_p2 = scmp.eq.s32.totalorder %s836_s18, 0 }
   0x9   : > { %p40_p3 = scmp.ne.s32.totalorder %s828_s16, %s824_s15  ;;  %p41_p4 = scmp.eq.s32.totalorder %s898_s19, 0 }
   0xa   : > { %s914_s24 = scalar_select %p25_p1, %s832_s17, %s27_s22  }
   0xb   : > { %p36_p5 = por %p35_p2, %p34_p0  ;;  %p916_p6 = por %p41_p4, %p40_p3 }
   0xc   : > { %p127_p7 = scmp.eq.s32.totalorder %s898_s19, 1  ;;  %p133_p8 = scmp.eq.s32.totalorder %s611_s20, 1 }
   0xd   : > { %p667_p10 = scmp.lt.s32.totalorder %s836_s18, 2  ;;  %s162_s28 = sand.u32 1, %s832_s17  }
   0xe   : > { %p923_p11 = por %p127_p7, %p34_p0  ;;  %p927_p12 = por %p133_p8, %p40_p3 }
   0xf   : > { %s614_s29 = sshll.u32 %s836_s18, 7  ;;  %s653_s30 = smul.u32 40, %s162_s28 }
  0x10   : > { %s1104_s26 = scalar_select %p923_p11, 1, 0 }
  0x11   : > { %s1105_s27 = scalar_select %p927_p12, 1, 0 }
  0x12   : > { %s936_s7 = scalar_lea.hbm %s1097_s0, %s614_s29  ;;  %p938_p13 = pnand %p667_p10, %p36_p5 }
  0x13   : > { %s166_s9 = scalar_lea.vmem [#allocation2], %s653_s30  ;;  %s945_s11 = scalar_lea.sflag [#allocation3], %s162_s28 }
  0x14   : > { %s172_s10 = sshll.u32 %s166_s9, 4  ;;  %s740_s12 = scalar_lea.hbm %s936_s7, 640  ;;  %s942_s10 = int_to_ptr.vmem [resolvable:$true] %s172_s10 }
  0x15   : > { %p741_p1 = scmp.ne.s32.totalorder %s936_s7, %s740_s12  ;;  %p742_p2 = pneg %p938_p13 }
  0x16   : > { %s745_s20 = scalar_lea.hbm %s1097_s0, 1280  ;;  %p746_p5 = scmp.lt.u32.totalorder %s936_s7, %s1097_s0 }
  0x17   : > { %p743_p3 = pnand %p742_p2, %p741_p1  ;;  %p747_p7 = scmp.lt.u32.totalorder %s745_s20, %s740_s12 }
  0x18   : > { %p749_p10 = scmp.lt.u32.totalorder %s740_s12, %s936_s7 }
  0x19   : > { %p744_p4 = pneg %p743_p3  ;;  %p748_p8 = por %p747_p7, %p746_p5 }
  0x1b   : > { %p750_p9 = por %p749_p10, %p748_p8 }
  0x1d   : > { %p751_p0 = pnand %p750_p9, %p744_p4 }
  0x1f   : > { %754 = shalt.err (!%p751_p0)
}
  0x20   : > { %s755_s28 = scalar_lea.vmem %s942_s10, 640  ;;  %s838_s29 = smov [#allocation2]  }
  0x21   : > { %p756_p1 = scmp.ne.s32.totalorder %s942_s10, %s755_s28  ;;  %s760_s30 = sshll.u32 %s838_s29, 4  ;;  %s761_s30 = int_to_ptr.vmem [resolvable:$false] %s760_s30 }
  0x22   : > { %s762_s5 = scalar_lea.vmem %s761_s30, 1280  ;;  %p763_p11 = scmp.lt.s32.totalorder %s942_s10, %s761_s30 }
  0x23   : > { %p758_p3 = pnand %p756_p1, %p742_p2  ;;  %p764_p5 = scmp.lt.s32.totalorder %s762_s5, %s755_s28 }
  0x25   : > { %p759_p12 = pneg %p758_p3  ;;  %p765_p7 = por %p764_p5, %p763_p11 }
  0x27   : > { %p766_p8 = pnand %p765_p7, %p759_p12 }
  0x29   : > { %769 = shalt.err (!%p766_p8)
}
  0x2a   : > { %s839_s6 = smov 256   ;;  %s840_s9 = smov 128  }
  0x2b   : > { %s841_s12 = smov 8   ;;  %p180_p9 = scmp.lt.s32.totalorder %s836_s18, 3 }
  0x2c   : > { %662 = dma.hbm_to_vmem [thread:$0]  (!%p938_p13), %s936_s7, 640, %s942_s10, %s945_s11, %s839_s6, %s840_s9, %s841_s12  }
  0x2d   : > { %p1107_p0 = scmp.ge.s32.totalorder %s836_s18, 1 }
  0x2f   : > { %p181_p2 = pnand %p1107_p0, %p180_p9 }
  0x30   : > { %s977_s13 = sand.u32 (!%p181_p2), 1, %s828_s16  }
  0x31   : > { %184 = sbr.rel (%p181_p2) target bundleno = 578 (0x242), region = 36  ;;  %s187_s20 = scalar_lea.sflag (!%p181_p2), [#allocation3], %s977_s13 }
  0x32   : > { %s654_s14 = smul.u32 (!%p181_p2), 40, %s977_s13 }
  0x34   : > { %s190_s22 = scalar_lea.vmem (!%p181_p2), [#allocation2], %s654_s14 }
  0x38   : > { %815 = dma.done.wait (%p916_p6), %s187_s20, 640  }
  0x39   : > { %817 = vsyncadd (%p916_p6), %s187_s20, 4294966656  ;;  %v842_v0 = vmov 3   ;;  %v985_v1 = vld [vmem:[%s190_s22] sm:$0xff]  ;;  %v987_v2 = vld [vmem:[%s190_s22 + $0x8] sm:$0xff]  ;;  %vm373_vm0 = vcmask 326656   ;;  %vm380_vm1 = vcmask 1043456  }
  0x3a   : > { %713 = vset.pattern.permute.xlu0 %v842_v0  ;;  %714 = vset.pattern.permute.xlu1 %v842_v0  ;;  %v989_v3 = vld [vmem:[%s190_s22 + $0x10] sm:$0xff]  ;;  %v340_v4 = vpack.c.bf16 %v987_v2, %v985_v1  ;;  %v993_v5 = vld [vmem:[%s190_s22 + $0x18] sm:$0xff]  ;;  %v995_v6 = vld [vmem:[%s190_s22 + $0x20] sm:$0xff]  ;;  %v843_v16 = vmov 0   ;;  %v844_v17 = vmov 0.0   ;;  %v845_v18 = vmov 1  }
  0x3b   : > { %v341_v7 = vpack.c.bf16 %v993_v5, %v989_v3  ;;  %v733_v8 = vld [vmem:[%s1098_s1] sm:$0xff]   ;;  %v222_v10 = vld [vmem:[%s1100_s3 + $0x10] sm:$0xff]  ;;  %v342_v11 = vpack.c.bf16 %v995_v6, %v995_v6  ;;  %v221_v12 = vld [vmem:[%s1100_s3 + $0x8] sm:$0xff]  ;;  %644 = vmatprep.subr.bf16.mxu1 %v844_v17  ;;  %vm846_vm2 = vmmov 0   ;;  %v847_v19 = vmov 2   ;;  %s623_s8 = sshll.u32 %s898_s19, 4 }
  0x3c   : > { %634 = vmatprep.subr.bf16.mxu0 %v340_v4  ;;  %v220_v9 = vld [vmem:[%s1100_s3] sm:$0xff]  ;;  %640 = vmatprep.mubr.msk.bf16.mxu0 %vm373_vm0, %v733_v8  ;;  %v223_v13 = vld [vmem:[%s1100_s3 + $0x18] sm:$0xff]  ;;  %v734_v15 = vld [vmem:[%s1098_s1 + $0x8] sm:$0xff]   ;;  %v848_v21 = vmov 4   ;;  %v849_v22 = vmov 5   ;;  %v850_v23 = vmov 6   ;;  %s1053_s29 = scalar_lea.hbm %s1101_s4, %s623_s8 }
  0x3d   : > { %635 = vmatpush3.bf16.msra.mxu0 %v340_v4  ;;  %348 = vperm.xlu0 %713, %v220_v9   ;;  %v382_v14 = vsel %vm380_vm1, %v342_v11, 0  ;;  %v224_v20 = vld [vmem:[%s1100_s3 + $0x20] sm:$0xff]  ;;  %vm454_vm3 = vcmask 261120   ;;  %s213_s10 = scalar_lea.vmem [#allocation5], %s977_s13  ;;  %s533_s30 = scalar_lea.sflag [#allocation4], %s977_s13 }
  0x3e   : > { %636 = vmatprep.subr.bf16.mxu0 %v341_v7  ;;  %356 = vperm.xlu1 %714, %v222_v10   ;;  %v225_v24 = vld [vmem:[%s1100_s3] sm:$0x1]  ;;  %s545_s11 = sshll.u32 %s213_s10, 4  ;;  %p1108_p11 = scmp.ne.s32.totalorder %s1104_s26, 0  ;;  %s1055_s11 = int_to_ptr.vmem [resolvable:$true] %s545_s11 }
  0x3f   : > { %648 = vmatprep.mubr.msk.bf16.mxu1 %vm846_vm2, %v844_v17  ;;  %v735_v43 = vld [vmem:[%s1099_s2] sm:$0xff]   ;;  %s770_s5 = scalar_lea.vmem %s1055_s11, 16  ;;  %s851_s19 = smov [#allocation5]  }
  0x40   : > { %p771_p6 = scmp.ne.s32.totalorder %s1055_s11, %s770_s5  ;;  %s774_s6 = sshll.u32 %s851_s19, 4  ;;  %s775_s6 = int_to_ptr.vmem [resolvable:$false] %s774_s6 }
  0x41   : > { %637 = vmatpush3.bf16.msra.mxu0 %v341_v7  ;;  %352 = vperm.xlu0 %713, %v221_v12   ;;  %s776_s9 = scalar_lea.vmem %s775_s6, 32  ;;  %p777_p4 = scmp.lt.s32.totalorder %s1055_s11, %s775_s6 }
  0x42   : > { %652 = vmatprep.subr.msk.bf16.mxu0 %vm380_vm1, %v342_v11  ;;  %360 = vperm.xlu1 %714, %v223_v13   ;;  %p772_p12 = pnand %p771_p6, %p1108_p11  ;;  %p778_p10 = scmp.lt.s32.totalorder %s776_s9, %s770_s5 }
  0x44   : > { %p773_p13 = pneg %p772_p12  ;;  %p779_p1 = por %p778_p10, %p777_p4 }
  0x45   : > { %639 = vmatpush3.bf16.msra.mxu0 %v382_v14  ;;  %717 = vset.pattern.permute.xlu0 %v845_v18 }
  0x46   : > { %715 = vset.pattern.permute.xlu1 %v843_v16  ;;  %271 = vperm.xlu0 %717, %v221_v12   ;;  %p780_p3 = pnand %p779_p1, %p773_p13 }
  0x47   : > { %233 = vperm.xlu1 %715, %v221_v12  }
  0x48   : > { %641 = vmatmul.mubr.msk.bf16.vlgmr.msra.gmra.mrb[0].mxu0 %vm373_vm0, %v734_v15 }
  0x4a   : > { %718 = vset.pattern.permute.xlu0 %v843_v16 }
  0x4b   : > { %716 = vset.pattern.permute.xlu1 %v845_v18  ;;  %228 = vperm.xlu0 %718, %v220_v9  }
  0x4c   : > { %267 = vperm.xlu1 %716, %v220_v9  }
  0x4f   : > { %243 = vperm.xlu0 %718, %v223_v13  }
  0x50   : > { %719 = vset.pattern.permute.xlu1 %v843_v16 }
  0x51   : > { %238 = vperm.xlu1 %719, %v222_v10  }
  0x53   : > { %722 = vset.pattern.permute.xlu0 %v847_v19 }
  0x54   : > { %306 = vperm.xlu0 %722, %v221_v12  }
  0x55   : > { %720 = vset.pattern.permute.xlu1 %v845_v18 }
  0x56   : > { %275 = vperm.xlu1 %720, %v222_v10  }
  0x58   : > { %310 = vperm.xlu0 %722, %v222_v10  }
  0x5a   : > { %279 = vperm.xlu1 %720, %v223_v13  }
  0x5c   : > { %726 = vset.pattern.permute.xlu0 %v848_v21 }
  0x5d   : > { %442 = vperm.xlu0 %726, %v220_v9  }
  0x5e   : > { %721 = vset.pattern.permute.xlu1 %v847_v19 }
  0x5f   : > { %302 = vperm.xlu1 %721, %v220_v9  }
  0x61   : > { %729 = vset.pattern.permute.xlu0 %v849_v22 }
  0x62   : > { %502 = vperm.xlu0 %729, %v220_v9  }
  0x63   : > { %723 = vset.pattern.permute.xlu1 %v843_v16 }
  0x64   : > { %248 = vperm.xlu1 %723, %v224_v20  }
  0x66   : > { %732 = vset.pattern.permute.xlu0 %v850_v23 }
  0x68   : > { %724 = vset.pattern.permute.xlu1 %v845_v18 }
  0x69   : > { %283 = vperm.xlu1 %724, %v224_v20  }
  0x6d   : > { %725 = vset.pattern.permute.xlu1 %v847_v19 }
  0x6e   : > { %314 = vperm.xlu1 %725, %v223_v13  }
  0x72   : > { %727 = vset.pattern.permute.xlu1 %v848_v21 }
  0x73   : > { %446 = vperm.xlu1 %727, %v221_v12  }
  0x77   : > { %728 = vset.pattern.permute.xlu1 %v847_v19 }
  0x78   : > { %318 = vperm.xlu1 %728, %v224_v20  }
  0x7c   : > { %730 = vset.pattern.permute.xlu1 %v849_v22 }
  0x7d   : > { %506 = vperm.xlu1 %730, %v221_v12  }
  0x81   : > { %731 = vset.pattern.permute.xlu1 %v850_v23 }
  0x82   : > { %521 = vperm.xlu1 %731, %v225_v24  }
  0xbc   : > { %v349_v26 = vpop.permute.xlu0 %348 }
  0xbd   : > { %v357_v25 = vpop.permute.xlu1 %356 }
  0xc0   : > { %v353_v33 = vpop.permute.xlu0 %352 }
  0xc1   : > { %v361_v28 = vpop.permute.xlu1 %360 }
  0xc5   : > { %v272_v49 = vpop.permute.xlu0 %271 }
  0xc6   : > { %v234_v44 = vpop.permute.xlu1 %233  ;;  %v287_v56 = vmul.f32 %v272_v49, %v987_v2 }
  0xc7   : > { %v252_v54 = vmul.f32 %v234_v44, %v987_v2 }
  0xca   : > { %v229_v51 = vpop.permute.xlu0 %228 }
  0xcb   : > { %v268_v45 = vpop.permute.xlu1 %267  ;;  %v251_v57 = vmul.f32 %v229_v51, %v985_v1 }
  0xcc   : > { %v286_v55 = vmul.f32 %v268_v45, %v985_v1 }
  0xcd   : > { %v256_v62 = vadd.f32 %v252_v54, %v251_v57 }
  0xce   : > { %v244_v53 = vpop.permute.xlu0 %243  ;;  %v291_v61 = vadd.f32 %v287_v56, %v286_v55 }
  0xcf   : > { %v254_v8 = vmul.f32 %v244_v53, %v993_v5 }
  0xd0   : > { %v239_v46 = vpop.permute.xlu1 %238 }
  0xd1   : > { %v253_v59 = vmul.f32 %v239_v46, %v989_v3 }
  0xd3   : > { %v307_v63 = vpop.permute.xlu0 %306  ;;  %v257_v9 = vadd.f32 %v256_v62, %v253_v59 }
  0xd4   : > { %v322_v11 = vmul.f32 %v307_v63, %v987_v2 }
  0xd5   : > { %v276_v47 = vpop.permute.xlu1 %275  ;;  %v258_v14 = vadd.f32 %v257_v9, %v254_v8 }
  0xd6   : > { %v288_v60 = vmul.f32 %v276_v47, %v989_v3 }
  0xd7   : > { %v311_v12 = vpop.permute.xlu0 %310 }
  0xd8   : > { %v292_v7 = vadd.f32 %v291_v61, %v288_v60  ;;  %v323_v19 = vmul.f32 %v311_v12, %v989_v3 }
  0xd9   : > { %v280_v48 = vpop.permute.xlu1 %279 }
  0xda   : > { %v289_v4 = vmul.f32 %v280_v48, %v993_v5 }
  0xdc   : > { %v293_v13 = vadd.f32 %v292_v7, %v289_v4 }
  0xde   : > { %v303_v50 = vpop.permute.xlu1 %302 }
  0xdf   : > { %v321_v10 = vmul.f32 %v303_v50, %v985_v1 }
  0xe1   : > { %v326_v18 = vadd.f32 %v322_v11, %v321_v10 }
  0xe3   : > { %v249_v52 = vpop.permute.xlu1 %248  ;;  %v327_v23 = vadd.f32 %v326_v18, %v323_v19 }
  0xe4   : > { %v255_v16 = vmul.f32 %v249_v52, %v995_v6 }
  0xe6   : > { %v259_v21 = vadd.f32 %v258_v14, %v255_v16 }
  0xe8   : > { %v284_v58 = vpop.permute.xlu1 %283 }
  0xed   : > { %v315_v0 = vpop.permute.xlu1 %314 }
  0xee   : > { %v324_v22 = vmul.f32 %v315_v0, %v993_v5 }
  0xf2   : > { %v447_v15 = vpop.permute.xlu1 %446 }
  0xf7   : > { %v319_v24 = vpop.permute.xlu1 %318 }
  0xf8   : > { %v325_v2 = vmul.f32 %v319_v24, %v995_v6 }
 0x11b   : > { %v642_v27 = vpop.f32.mrb[0].mxu0 }
 0x11c   : > { %v427_v29 = vadd.f32 %v642_v27, %v357_v25  ;;  %v418_v30 = vpop.f32.mrb[1].mxu0  ;;  %v260_v25 = vrot.slane %v259_v21, 4 }
 0x11d   : > { %v419_v31 = vadd.f32 %v418_v30, %v349_v26  ;;  %v643_v32 = vpop.f32.mrb[2].mxu0  ;;  %v328_v26 = vadd.f32 %v327_v23, %v324_v22 }
 0x11e   : > { %v430_v34 = vadd.f32 %v643_v32, %v361_v28  ;;  %v421_v35 = vpop.f32.mrb[3].mxu0  ;;  %v435_v37 = vmax.f32 %v427_v29, 0.0  ;;  %v261_v28 = vadd.f32 %v260_v25, %v259_v21 }
 0x11f   : > { %v422_v36 = vadd.f32 %v421_v35, %v353_v33  ;;  %v433_v39 = vmax.f32 %v419_v31, 0.0  ;;  %v329_v29 = vadd.f32 %v328_v26, %v325_v2  ;;  %v443_v33 = vpop.permute.xlu0 %442 }
 0x120   : > { %v436_v38 = vmax.f32 %v430_v34, 0.0  ;;  %v262_v31 = vrot.slane %v261_v28, 2 }
 0x121   : > { %v434_v40 = vmax.f32 %v422_v36, 0.0  ;;  %v330_v32 = vrot.slane %v329_v29, 4 }
 0x122   : > { %v440_v41 = vpack.c.bf16 %v436_v38, %v435_v37  ;;  %v263_v35 = vadd.f32 %v262_v31, %v261_v28 }
 0x123   : > { %v439_v42 = vpack.c.bf16 %v434_v40, %v433_v39  ;;  %v331_v36 = vadd.f32 %v330_v32, %v329_v29 }
 0x124   : > { %v264_v44 = vrot.slane %v263_v35, 1 }
 0x125   : > { %645 = vmatpush3.bf16.msra.mxu1 %v439_v42  ;;  %v503_v42 = vpop.permute.xlu0 %502  ;;  %v332_v45 = vrot.slane %v331_v36, 2 }
 0x126   : > { %646 = vmatprep.subr.bf16.mxu1 %v844_v17  ;;  %v290_v17 = vmul.f32 %v284_v58, %v995_v6  ;;  %v507_v6 = vpop.permute.xlu1 %506  ;;  %v265_v52 = vadd.f32 %v264_v44, %v263_v35 }
 0x127   : > { %v333_v50 = vadd.f32 %v332_v45, %v331_v36 }
 0x128   : > { %v294_v20 = vadd.f32 %v293_v13, %v290_v17  ;;  %v336_v56 = vadd.f32 1.0, %v265_v52 }
 0x129   : > { %647 = vmatpush3.bf16.msra.mxu1 %v440_v41  ;;  %v334_v55 = vrot.slane %v333_v50, 1 }
 0x12a   : > { %v295_v1 = vrot.slane %v294_v20, 4  ;;  %v522_v4 = vpop.permute.xlu1 %521 }
 0x12b   : > { %v335_v59 = vadd.f32 %v334_v55, %v333_v50 }
 0x12c   : > { %649 = vmatmul.mubr.msk.bf16.vlgmr.msra.gmra.mrb[0].mxu1 %vm454_vm3, %v735_v43  ;;  %v296_v27 = vadd.f32 %v295_v1, %v294_v20 }
 0x12e   : > { %v297_v30 = vrot.slane %v296_v27, 2 }
 0x130   : > { %v298_v3 = vadd.f32 %v297_v30, %v296_v27 }
 0x132   : > { %v299_v43 = vrot.slane %v298_v3, 1 }
 0x134   : > { %v300_v49 = vadd.f32 %v299_v43, %v298_v3 }
 0x136   : > { %v337_v57 = vadd.f32 1.0, %v300_v49 }
 0x138   : > { %v338_v60 = vmul.f32 %v337_v57, %v336_v56 }
 0x13a   : > { %v339_v63 = vmul.f32 %v338_v60, %v335_v59 }
 0x1ff   : > { %v492_v34 = vpop.f32.mrb[0].mxu1 }
 0x200   : > { %v493_v37 = vadd.f32 %v492_v34, %v443_v33  ;;  %v650_v5 = vpop.f32.mrb[1].mxu1 }
 0x201   : > { %v495_v38 = vpop.f32.mrb[2].mxu1 }
 0x202   : > { %v499_v39 = vmax.f32 %v493_v37, 0.0  ;;  %v496_v40 = vadd.f32 %v495_v38, %v447_v15  ;;  %v651_v41 = vpop.f32.mrb[3].mxu1 }
 0x204   : > { %v500_v46 = vmax.f32 %v496_v40, 0.0  ;;  %v509_v47 = vmul.f32 %v503_v42, %v499_v39 }
 0x206   : > { %v510_v48 = vmul.f32 %v507_v6, %v500_v46 }
 0x208   : > { %v511_v51 = vadd.f32 %v510_v48, %v509_v47 }
 0x20a   : > { %v512_v53 = vrot.slane %v511_v51, 4 }
 0x20c   : > { %v513_v54 = vadd.f32 %v512_v53, %v511_v51 }
 0x20e   : > { %v514_v58 = vrot.slane %v513_v54, 2 }
 0x210   : > { %v515_v61 = vadd.f32 %v514_v58, %v513_v54 }
 0x212   : > { %v516_v62 = vrot.slane %v515_v61, 1 }
 0x214   : > { %v517_v0 = vadd.f32 %v516_v62, %v515_v61 }
 0x216   : > { %v518_v7 = vadd.f32 %v517_v0, %v339_v63 }
 0x218   : > { %v524_v8 = vadd.f32 %v522_v4, %v518_v7 }
 0x21a   : > { %v622_v9 = vmul.f32 -1.442695, %v524_v8 }
 0x21c   : > { %736 = vpow2.f32 %v622_v9 }
 0x226   : > { %v737_v10 = vpop.eup %736 }
 0x227   : > { %v528_v11 = vadd.f32 1.0, %v737_v10 }
 0x229   : > { %738 = vrcp.f32 %v528_v11 }
 0x233   : > { %v739_v12 = vpop.eup %738 }
 0x234   : > { %531 = vst [vmem:[%s213_s10] sm:$0x1] %v739_v12 }
 0x235   : > { %783 = shalt.err (!%p780_p3)
}
 0x236   : > { %s784_s13 = scalar_lea.hbm %s1053_s29, 16  ;;  %s788_s20 = scalar_lea.hbm %s1101_s4, 32 }
 0x237   : > { %p785_p5 = scmp.ne.s32.totalorder %s1053_s29, %s784_s13  ;;  %p789_p9 = scmp.lt.u32.totalorder %s1053_s29, %s1101_s4 }
 0x238   : > { %p790_p0 = scmp.lt.u32.totalorder %s788_s20, %s784_s13  ;;  %p792_p6 = scmp.lt.u32.totalorder %s784_s13, %s1053_s29 }
 0x239   : > { %p786_p7 = pnand %p785_p5, %p1108_p11 }
 0x23a   : > { %p791_p2 = por %p790_p0, %p789_p9 }
 0x23b   : > { %p787_p8 = pneg %p786_p7 }
 0x23c   : > { %p793_p12 = por %p792_p6, %p791_p2 }
 0x23e   : > { %p794_p13 = pnand %p793_p12, %p787_p8 }
 0x240   : > { %797 = shalt.err (!%p794_p13)
}
 0x241   : > { %657 = dma.vmem_to_hbm [thread:$0]  (%p1108_p11), %s1055_s11, 16, %s1053_s29, %s533_s30  }
 0x242 PF: > { %s557_s7 = sand.u32 1, %s824_s15   ;;  %p1109_p4 = scmp.ne.s32.totalorder %s1105_s27, 0 }
 0x243   : > { %p1110_p10 = scmp.ge.s32.totalorder %s836_s18, 2  ;;  %s558_s8 = scalar_lea.sflag [#allocation4], %s557_s7 }
 0x245   : > { %p664_p1 = pnand %p1110_p10, %p1109_p4 }
 0x247   : > { %819 = dma.done.wait (!%p664_p1), %s558_s8, 16  }
 0x248   : > { %821 = vsyncadd (!%p664_p1), %s558_s8, 4294967280  ;;  %p17_p3 = scmp.ge.s32.totalorder %s902_s21, 4   ;;  %s1111_s15 = smov %s828_s16 }
 0x249   : > { %s1112_s16 = smov %s832_s17  ;;  %s1113_s17 = smov %s914_s24 }
 0x24a   : > { %s1114_s18 = smov %s902_s21  ;;  %19 = sbr.rel (!%p17_p3) target bundleno = 5 (0x5), region = 81 }
 0x251   :  { %562 = vsyncpa [#allocation3], 1 }
 0x252   :  { %564 = vsyncpa [#allocation3 + $0x1], 1 }
 0x253   :  { %565 = vsyncpa [#allocation4], 1 }
 0x254   :  { %567 = vsyncpa [#allocation4 + $0x1], 1 }

</bundles_post_ra>
